<compile_context>
chip_gen: v6e
topology: v6e:2x2x1
jax: 0.10.0
libtpu: 0.0.40
codegen_flags: <defaults>
</compile_context>

<pallas_src>
import jax
import jax.numpy as jnp
from jax.experimental import pallas as pl
from jax.experimental.pallas import tpu as pltpu  # noqa: F401  (kept for tuning hooks)

KH, KW = 3, 3  # fixed (3, 3) kernel from the module


def conv_gemm_relu_kernel(p_ref, w_ref, o_ref):
    """Single MXU GEMM + fused ReLU epilogue.

    p_ref: (K+1, L)    im2col patches + ones row; L = pad128(N*Hout*Wout) lanes
    w_ref: (Cout, K+1) flattened conv weights with bias as last column
    o_ref: (Cout, L)   lane-dense output slab (unmasked full-block store)
    """
    acc = jnp.dot(w_ref[...], p_ref[...],
                  preferred_element_type=jnp.float32)          # (Cout, L)
    o_ref[...] = jnp.maximum(acc, 0.0).astype(o_ref.dtype)


def my_conv_model3(xs, weight, bias):
    """xs: list of NCHW arrays (torch.cat(x, dim=1) semantics).
    weight: (Cout, Cin, 3, 3) torch OIHW;  bias: (Cout,).
    Returns NCHW output matching PyTorch Conv2d((3,3), valid) + ReLU."""
    N, _, H, W = xs[0].shape
    Cout, Cin = weight.shape[0], weight.shape[1]
    Hout, Wout = H - KH + 1, W - KW + 1
    HW = Hout * Wout
    NHW = N * HW
    LANES = pl.cdiv(NHW, 128) * 128                    # lane dim, 128-multiple
    dtype = xs[0].dtype

    # im2col per input tensor with K first; join along the contraction axis.
    # K ordering is (ci_global, kh, kw) so it matches weight.reshape(Cout, Cin*9).
    slabs = []
    for xi in xs:
        Ci = xi.shape[1]
        taps = jnp.stack(
            [xi[:, :, kh:kh + Hout, kw:kw + Wout]
             for kh in range(KH) for kw in range(KW)],
            axis=2)                                    # (N, Ci, 9, Hout, Wout)
        slabs.append(jnp.transpose(taps, (1, 2, 0, 3, 4))
                     .reshape(Ci * KH * KW, NHW))      # (Ci*9, N*HW)
    patches = (jnp.concatenate(slabs, axis=0)
               if len(slabs) > 1 else slabs[0])        # (K, N*HW)
    K = Cin * KH * KW                                  # 9 * Cin

    # Pad lanes to a 128 multiple and fold bias in as a constant-1 row.
    patches = jnp.pad(patches, ((0, 0), (0, LANES - NHW)))
    patches = jnp.concatenate(
        [patches, jnp.ones((1, LANES), dtype)], axis=0)        # (K+1, LANES)
    w2 = jnp.concatenate(
        [weight.reshape(Cout, K), bias.reshape(Cout, 1)],
        axis=1).astype(dtype)                                   # (Cout, K+1)

    # Single grid-less call: whole (tiny) operands live in VMEM, one GEMM.
    out_pad = pl.pallas_call(
        conv_gemm_relu_kernel,
        out_shape=jax.ShapeDtypeStruct((Cout, LANES), dtype),
    )(patches, w2)

    # Drop pad lanes; (Cout, N*HW) -> NCHW is a tiny reshape + transpose.
    out = out_pad[:, :NHW].reshape(Cout, N, Hout, Wout)
    return jnp.transpose(out, (1, 0, 2, 3))


if __name__ == "__main__":
    # Small shapes consistent with the module: Conv2d(inp=4, out=8, (3,3)),
    # forward receives a list of two NCHW tensors with 2 channels each.
    N, H, W = 2, 16, 16
    C0, C1 = 2, 2          # concat -> Cin = 4
    Cin, Cout = C0 + C1, 8

    key = jax.random.PRNGKey(0)
    k0, k1, kw, kb = jax.random.split(key, 4)
    x0 = jax.random.uniform(k0, (N, C0, H, W), dtype=jnp.float32)
    x1 = jax.random.uniform(k1, (N, C1, H, W), dtype=jnp.float32)

    # Deterministic parameter init (matches nn.Conv2d default bound).
    fan_in = Cin * KH * KW
    bound = 1.0 / (fan_in ** 0.5)
    weight = jax.random.uniform(kw, (Cout, Cin, KH, KW), jnp.float32,
                                minval=-bound, maxval=bound)
    bias = jax.random.uniform(kb, (Cout,), jnp.float32,
                              minval=-bound, maxval=bound)

    out = my_conv_model3([x0, x1], weight, bias)
    out = jax.block_until_ready(out)
    assert out.shape == (N, Cout, H - 2, W - 2), out.shape

    # Reference check against XLA conv (same NCHW semantics as the module).
    x_cat = jnp.concatenate([x0, x1], axis=1)
    ref = jax.lax.conv_general_dilated(
        x_cat, weight, window_strides=(1, 1), padding="VALID",
        dimension_numbers=("NCHW", "OIHW", "NCHW"))
    ref = jnp.maximum(ref + bias[None, :, None, None], 0.0)
    assert jnp.allclose(out, ref, rtol=1e-3, atol=1e-3), (
        float(jnp.max(jnp.abs(out - ref))))

    print("KERNEL_OK")
</pallas_src>

<mosaic_0001>
module attributes {stable_mosaic.version = 11 : i64} {
  func.func @conv_gemm_relu_kernel(%arg0: memref<37x512xf32, #tpu.memory_space<vmem>>, %arg1: memref<8x37xf32, #tpu.memory_space<vmem>>, %arg2: memref<8x512xf32, #tpu.memory_space<vmem>>) attributes {dimension_semantics = [], scalar_prefetch = 0 : i64, scratch_operands = 0 : i64, tpu.core_type = #tpu.core_type<tc>} {
    %c0 = arith.constant 0 : index
    %c0_0 = arith.constant 0 : index
    %0 = vector.load %arg1[%c0, %c0_0] : memref<8x37xf32, #tpu.memory_space<vmem>>, vector<8x37xf32>
    %c0_1 = arith.constant 0 : index
    %c0_2 = arith.constant 0 : index
    %1 = vector.load %arg0[%c0_1, %c0_2] : memref<37x512xf32, #tpu.memory_space<vmem>>, vector<37x512xf32>
    %cst = arith.constant dense<0.000000e+00> : vector<8x512xf32>
    %2 = tpu.matmul %0, %1, %cst {dimension_numbers = #tpu.dot_dimension_numbers<[1], [0], [0], [1], [0, 0, 1, 1], [], []>} : vector<8x37xf32>, vector<37x512xf32>, vector<8x512xf32> -> vector<8x512xf32>
    %cst_3 = arith.constant 0.000000e+00 : f32
    %3 = vector.broadcast %cst_3 : f32 to vector<8x512xf32>
    %4 = arith.maximumf %2, %3 : vector<8x512xf32>
    %c0_4 = arith.constant 0 : index
    %c0_5 = arith.constant 0 : index
    %5 = vector.load %arg2[%c0_4, %c0_5] : memref<8x512xf32, #tpu.memory_space<vmem>>, vector<8x512xf32>
    tpu.vector_store %arg2[%c0_4, %c0_5], %4 {strides = array<i32>} : memref<8x512xf32, #tpu.memory_space<vmem>>, vector<8x512xf32>,
    return
  }
}

</mosaic_0001>

<bundles_post_ra>
// kernel: tpu_custom_call.1
= control target key start
LH: loop header
LB: loop body
LE: loop exit
PB: predicated region body
PF: predicated region fallthrough
CT: control target
= control target key end

     0   :  { %7 = vsyncpa [#allocation3], 0  ;;  %s350_s0 = inlined_call_operand.hbm [shape: f32[37,512], index: 0, kind: input, shape index: {}]   ;;  %s351_s1 = inlined_call_operand.hbm [shape: f32[8,37], index: 1, kind: input, shape index: {}]   ;;  %s352_s2 = inlined_call_operand.hbm [shape: f32[8,512], index: 2, kind: output, shape index: {}]  }
   0x1   :  { %8 = vsyncpa [#allocation6], 0 }
   0x2   :  { %9 = vsyncpa [#allocation4], 0  ;;  %s320_s9 = smov [#allocation2]  }
   0x3   :  { %s15_s10 = sshll.u32 %s320_s9, 4  ;;  %s16_s10 = int_to_ptr.vmem [resolvable:$true] %s15_s10 }
   0x4   :  { %s262_s11 = scalar_lea.vmem %s16_s10, 2560  ;;  %p267_p1 = scmp.lt.s32.totalorder %s16_s10, %s16_s10 }
   0x5   :  { %p263_p0 = scmp.ne.s32.totalorder %s16_s10, %s262_s11  ;;  %p268_p2 = scmp.lt.s32.totalorder %s262_s11, %s262_s11 }
   0x7   :  { %p269_p3 = por %p268_p2, %p267_p1 }
   0x9   :  { %p270_p4 = pnand %p269_p3, %p263_p0 }
   0xb   :  { %273 = shalt.err (!%p270_p4)
}
   0xc   :  { %s321_s12 = smov 512   ;;  %s322_s13 = smov 32  }
   0xd   :  { %21 = dma.hbm_to_vmem [thread:$0]  %s350_s0, 2560, %s16_s10, [#allocation3], %s321_s12, %s321_s12, %s322_s13  }
   0xe   :  { %s323_s16 = smov [#allocation5]  }
   0xf   :  { %s28_s17 = sshll.u32 %s323_s16, 4  ;;  %s29_s17 = int_to_ptr.vmem [resolvable:$true] %s28_s17 }
  0x10   :  { %s282_s18 = scalar_lea.vmem %s29_s17, 128  ;;  %p287_p6 = scmp.lt.s32.totalorder %s29_s17, %s29_s17 }
  0x11   :  { %p283_p5 = scmp.ne.s32.totalorder %s29_s17, %s282_s18  ;;  %p288_p7 = scmp.lt.s32.totalorder %s282_s18, %s282_s18 }
  0x13   :  { %p289_p8 = por %p288_p7, %p287_p6 }
  0x15   :  { %p290_p9 = pnand %p289_p8, %p283_p5 }
  0x17   :  { %293 = shalt.err (!%p290_p9)
}
  0x18   :  { %31 = dma.hbm_to_vmem [thread:$0]  %s351_s1, 128, %s29_s17, [#allocation6]  }
  0x19   :  { %314 = dma.done.wait [#allocation3], 2560  }
  0x1a   :  { %315 = vsyncadd [#allocation3], 4294964736 }
  0x1b   :  { %316 = dma.done.wait [#allocation6], 128  }
  0x1c   :  { %317 = vsyncadd [#allocation6], 4294967168  ;;  %v324_v0 = vmov 0.0   ;;  %vm63_vm0 = vcmask 1044480   ;;  %v56_v1 = vld [vmem:[#allocation2 + $0x88] sm:$0x1f] }
  0x1d   :  { %140 = vmatprep.mubr.f32.mxu0 %v324_v0  ;;  %211 = vmatprep.mubr.f32.mxu1 %v324_v0  ;;  %v58_v2 = vld [vmem:[#allocation2 + $0x98] sm:$0x1f]  ;;  %v55_v3 = vld [vmem:[#allocation2 + $0x80] sm:$0x1f]  ;;  %v57_v4 = vld [vmem:[#allocation2 + $0x90] sm:$0x1f] }
  0x1e   :  { %242 = vmatprep.subr.msk.mxu0 %vm63_vm0, %v56_v1  ;;  %245 = vmatprep.subr.msk.mxu1 %vm63_vm0, %v58_v2  ;;  %v52_v5 = vld [vmem:[#allocation2 + $0x68] sm:$0xff]  ;;  %v54_v6 = vld [vmem:[#allocation2 + $0x78] sm:$0xff]  ;;  %v51_v7 = vld [vmem:[#allocation2 + $0x60] sm:$0xff]  ;;  %vm59_vm1 = vcmask 302080   ;;  %s325_s0 = smov [#allocation7]  }
  0x1f   :  { %243 = vmatpush1.msk.msra.mxu0 %vm63_vm0, %v55_v3  ;;  %246 = vmatpush1.msk.msra.mxu1 %vm63_vm0, %v57_v4  ;;  %v53_v8 = vld [vmem:[#allocation2 + $0x70] sm:$0xff]  ;;  %v48_v9 = vld [vmem:[#allocation2 + $0x48] sm:$0xff]  ;;  %v50_v10 = vld [vmem:[#allocation2 + $0x58] sm:$0xff]  ;;  %s232_s1 = sshll.u32 %s325_s0, 4  ;;  %s233_s1 = int_to_ptr.vmem [resolvable:$true] %s232_s1 }
  0x20   :  { %100 = vmatprep.subr.mxu0 %v52_v5  ;;  %171 = vmatprep.subr.mxu1 %v54_v6  ;;  %v47_v11 = vld [vmem:[#allocation2 + $0x40] sm:$0xff]  ;;  %v49_v12 = vld [vmem:[#allocation2 + $0x50] sm:$0xff]  ;;  %v44_v13 = vld [vmem:[#allocation2 + $0x28] sm:$0xff]  ;;  %s294_s21 = scalar_lea.vmem %s233_s1, 512  ;;  %p299_p11 = scmp.lt.s32.totalorder %s233_s1, %s233_s1 }
  0x21   :  { %101 = vmatpush1.msra.mxu0 %v51_v7  ;;  %172 = vmatpush1.msra.mxu1 %v53_v8  ;;  %v46_v14 = vld [vmem:[#allocation2 + $0x38] sm:$0xff]  ;;  %v43_v15 = vld [vmem:[#allocation2 + $0x20] sm:$0xff]  ;;  %v45_v16 = vld [vmem:[#allocation2 + $0x30] sm:$0xff]  ;;  %p295_p10 = scmp.ne.s32.totalorder %s233_s1, %s294_s21  ;;  %p300_p12 = scmp.lt.s32.totalorder %s294_s21, %s294_s21 }
  0x22   :  { %102 = vmatprep.subr.mxu0 %v48_v9  ;;  %173 = vmatprep.subr.mxu1 %v50_v10  ;;  %v40_v17 = vld [vmem:[#allocation2 + $0x8] sm:$0xff]  ;;  %v42_v18 = vld [vmem:[#allocation2 + $0x18] sm:$0xff]  ;;  %v39_v19 = vld [vmem:[#allocation2] sm:$0xff] }
  0x23   :  { %103 = vmatpush1.msra.mxu0 %v47_v11  ;;  %174 = vmatpush1.msra.mxu1 %v49_v12  ;;  %v41_v20 = vld [vmem:[#allocation2 + $0x10] sm:$0xff]  ;;  %v38_v21 = vld [vmem:[#allocation5] sm:$0xff]  ;;  %p301_p13 = por %p300_p12, %p299_p11 }
  0x24   :  { %104 = vmatprep.subr.mxu0 %v44_v13  ;;  %175 = vmatprep.subr.mxu1 %v46_v14 }
  0x25   :  { %105 = vmatpush1.msra.mxu0 %v43_v15  ;;  %176 = vmatpush1.msra.mxu1 %v45_v16  ;;  %p302_p0 = pnand %p301_p13, %p295_p10 }
  0x26   :  { %106 = vmatprep.subr.mxu0 %v40_v17  ;;  %177 = vmatprep.subr.mxu1 %v42_v18 }
  0x27   :  { %107 = vmatpush1.msra.mxu0 %v39_v19  ;;  %178 = vmatpush1.msra.mxu1 %v41_v20 }
  0x28   :  { %244 = vmatmul.mubr.msk.f32.vlgmr.msra.gmra.mxu0 %vm59_vm1, %v38_v21  ;;  %247 = vmatmul.mubr.msk.f32.vlgmr.msra.gmra.mxu1 %vm59_vm1, %v38_v21 }
  0xe8   :  { %v142_v22 = vpop.f32.mrf.mxu0  ;;  %v213_v23 = vpop.f32.mrf.mxu1 }
  0xe9   :  { %v218_v24 = vmax.f32 %v142_v22, 0.0  ;;  %v220_v25 = vmax.f32 %v213_v23, 0.0 }
  0xea   :  { %v144_v26 = vpop.f32.mrf.mxu0  ;;  %v215_v27 = vpop.f32.mrf.mxu1 }
  0xeb   :  { %222 = vst [vmem:[#allocation7] sm:$0xff] %v218_v24  ;;  %224 = vst [vmem:[#allocation7 + $0x10] sm:$0xff] %v220_v25  ;;  %v219_v28 = vmax.f32 %v144_v26, 0.0  ;;  %v221_v29 = vmax.f32 %v215_v27, 0.0 }
  0xed   :  { %223 = vst [vmem:[#allocation7 + $0x8] sm:$0xff] %v219_v28  ;;  %225 = vst [vmem:[#allocation7 + $0x18] sm:$0xff] %v221_v29 }
  0xee   :  { %305 = shalt.err (!%p302_p0)
}
  0xef   :  { %235 = dma.vmem_to_hbm [thread:$0]  %s233_s1, 512, %s352_s2, [#allocation4]  }
  0xf0   :  { %318 = dma.done.wait [#allocation4], 512  }
  0xf1   :  { %319 = vsyncadd [#allocation4], 4294966784 }
  0xf2   :  { %239 = vsyncpa [#allocation3], 1 }
  0xf3   :  { %240 = vsyncpa [#allocation6], 1 }
  0xf4   :  { %241 = vsyncpa [#allocation4], 1 }

</bundles_post_ra>
